<compile_context>
chip_gen: v7x
topology: tpu7x:2x2x1
jax: 0.10.0
libtpu: 0.0.40
codegen_flags: <defaults>
</compile_context>

<pallas_src>
import functools

import jax
import jax.numpy as jnp
from jax.experimental import pallas as pl
from jax.experimental.pallas import tpu as pltpu


def _round_up(x, m):
    return ((x + m - 1) // m) * m


# ----------------------------- kernel ----------------------------------------


def _score_kernel(a_r_ref, a_i_ref,
                  embr_t_ref, embi_t_ref, lit_t_ref,
                  w_er_t_ref, w_lr_t_ref, b_r_t_ref,
                  w_ei_t_ref, w_li_t_ref, b_i_t_ref,
                  out_ref):
    """Literal-gate one entity tile (transposed layout) and score it.

    All matmuls are plain (M,K)@(K,N) with the lane dim = tile_n (>=128,
    lane-dense); f32 accumulation is forced; tanh/sigmoid run on VPU/EUP.
    """
    lit_t = lit_t_ref[...]
    # e2^T = tanh(W_e^T @ emb^T + W_l^T @ lit^T + b^T)  -> (E_pad, tile_n)
    e2r_t = jnp.tanh(
        jnp.dot(w_er_t_ref[...], embr_t_ref[...],
                preferred_element_type=jnp.float32)
        + jnp.dot(w_lr_t_ref[...], lit_t, preferred_element_type=jnp.float32)
        + b_r_t_ref[...])
    e2i_t = jnp.tanh(
        jnp.dot(w_ei_t_ref[...], embi_t_ref[...],
                preferred_element_type=jnp.float32)
        + jnp.dot(w_li_t_ref[...], lit_t, preferred_element_type=jnp.float32)
        + b_i_t_ref[...])

    # ComplEx score for this (batch tile, entity tile): A_r @ e2r^T + A_i @ e2i^T
    score = (jnp.dot(a_r_ref[...], e2r_t, preferred_element_type=jnp.float32)
             + jnp.dot(a_i_ref[...], e2i_t, preferred_element_type=jnp.float32))
    out_ref[...] = jax.nn.sigmoid(score)


# ----------------------------- planning --------------------------------------


def _vmem_limit_bytes():
    cap = 64 * 1024 * 1024  # conservative fallback (v7x-sized)
    try:
        info = pltpu.get_tpu_info()
        cap = int(getattr(info, "vmem_capacity_bytes", cap))
    except Exception:
        pass
    # ~100 MiB on 128 MiB generations (v5e/v6e), 48 MiB on 64 MiB v7x.
    return int(min(max(cap - 16 * 1024 * 1024, 32 * 1024 * 1024),
                   100 * 1024 * 1024))


def _pick_tile_n(n_pad, tile_b, e_pad, l_pad, table_bytes, vmem_limit):
    budget = int(vmem_limit * 0.6)  # headroom for compiler scratch / regalloc
    # Resident (constant-index) operands, double-buffered by the pipeline:
    resident = (2 * e_pad * e_pad + 2 * e_pad * l_pad) * table_bytes * 2  # W^T
    resident += 2 * tile_b * e_pad * 4 * 2                                # A_r/A_i
    resident += 2 * e_pad * 4 * 2                                         # biases
    for t in (8192, 4096, 2048, 1024, 512, 256, 128):
        if n_pad % t:
            continue
        if n_pad >= 256 and n_pad // t < 2:
            continue  # keep >=2 entity steps so v7x megacore has work on both TCs
        per_step = ((2 * e_pad + l_pad) * t * table_bytes  # streamed emb/lit slabs
                    + tile_b * t * 4) * 2                   # output block
        if resident + per_step <= budget:
            return t
    return 128


# ----------------------------- forward ---------------------------------------


@functools.partial(
    jax.jit,
    static_argnames=("tile_b", "tile_n", "e_pad", "l_pad", "n_pad", "b_pad",
                     "vmem_limit_bytes", "table_dtype"))
def _forward_impl(e1, rel, params, *, tile_b, tile_n, e_pad, l_pad, n_pad,
                  b_pad, vmem_limit_bytes, table_dtype):
    emb_e_real = params["emb_e_real"]      # (N, E)
    emb_e_img = params["emb_e_img"]        # (N, E)
    emb_rel_real = params["emb_rel_real"]  # (R, E)
    emb_rel_img = params["emb_rel_img"]    # (R, E)
    num_lit = params["num_lit"]            # (N, L)
    W_er, W_lr, b_r = params["W_er"], params["W_lr"], params["b_r"]
    W_ei, W_li, b_i = params["W_ei"], params["W_li"], params["b_i"]

    N, E = emb_e_real.shape
    L = num_lit.shape[1]
    B = e1.size

    # ---- batch side (tiny; plain jnp glue, cheaper than a pallas launch) ----
    e1_idx = jnp.pad(e1.reshape(-1), (0, b_pad - B))
    rel_idx = jnp.pad(rel.reshape(-1), (0, b_pad - B))
    e1r = jnp.take(emb_e_real, e1_idx, axis=0)       # (B_pad, E)
    e1i = jnp.take(emb_e_img, e1_idx, axis=0)
    relr = jnp.take(emb_rel_real, rel_idx, axis=0)
    reli = jnp.take(emb_rel_img, rel_idx, axis=0)
    e1lit = jnp.take(num_lit, e1_idx, axis=0)        # (B_pad, L)

    e1gr = jnp.tanh(e1r @ W_er + e1lit @ W_lr + b_r)
    e1gi = jnp.tanh(e1i @ W_ei + e1lit @ W_li + b_i)
    # Hoisted relation fold: pred = A_r @ e2r^T + A_i @ e2i^T  (exact 4-term ComplEx)
    a_r = jnp.pad(e1gr * relr - e1gi * reli, ((0, 0), (0, e_pad - E)))
    a_i = jnp.pad(e1gr * reli + e1gi * relr, ((0, 0), (0, e_pad - E)))

    # ---- entity side: padded + transposed slabs (lane dim = N_pad) ----------
    ent_r_t = jnp.pad(emb_e_real, ((0, n_pad - N), (0, e_pad - E))).T.astype(table_dtype)
    ent_i_t = jnp.pad(emb_e_img, ((0, n_pad - N), (0, e_pad - E))).T.astype(table_dtype)
    lit_t = jnp.pad(num_lit, ((0, n_pad - N), (0, l_pad - L))).T.astype(table_dtype)

    w_er_t = jnp.pad(W_er, ((0, e_pad - E), (0, e_pad - E))).T.astype(table_dtype)
    w_ei_t = jnp.pad(W_ei, ((0, e_pad - E), (0, e_pad - E))).T.astype(table_dtype)
    w_lr_t = jnp.pad(W_lr, ((0, l_pad - L), (0, e_pad - E))).T.astype(table_dtype)
    w_li_t = jnp.pad(W_li, ((0, l_pad - L), (0, e_pad - E))).T.astype(table_dtype)
    b_r_t = jnp.pad(b_r, ((0, 0), (0, e_pad - E))).T   # (E_pad, 1), f32
    b_i_t = jnp.pad(b_i, ((0, 0), (0, e_pad - E))).T

    grid = (b_pad // tile_b, n_pad // tile_n)
    pred = pl.pallas_call(
        _score_kernel,
        out_shape=jax.ShapeDtypeStruct((b_pad, n_pad), jnp.float32),
        grid_spec=pl.GridSpec(
            grid=grid,
            in_specs=[
                pl.BlockSpec((tile_b, e_pad), lambda i, j: (i, 0)),   # A_r
                pl.BlockSpec((tile_b, e_pad), lambda i, j: (i, 0)),   # A_i
                pl.BlockSpec((e_pad, tile_n), lambda i, j: (0, j)),   # emb_real^T
                pl.BlockSpec((e_pad, tile_n), lambda i, j: (0, j)),   # emb_img^T
                pl.BlockSpec((l_pad, tile_n), lambda i, j: (0, j)),   # num_lit^T (shared)
                pl.BlockSpec((e_pad, e_pad), lambda i, j: (0, 0)),    # W_er^T
                pl.BlockSpec((e_pad, l_pad), lambda i, j: (0, 0)),    # W_lr^T
                pl.BlockSpec((e_pad, 1), lambda i, j: (0, 0)),        # b_r^T
                pl.BlockSpec((e_pad, e_pad), lambda i, j: (0, 0)),    # W_ei^T
                pl.BlockSpec((e_pad, l_pad), lambda i, j: (0, 0)),    # W_li^T
                pl.BlockSpec((e_pad, 1), lambda i, j: (0, 0)),        # b_i^T
            ],
            out_specs=pl.BlockSpec((tile_b, tile_n), lambda i, j: (i, j))),
        compiler_params=pltpu.CompilerParams(
            dimension_semantics=("parallel", "parallel"),
            vmem_limit_bytes=vmem_limit_bytes),
    )(a_r, a_i, ent_r_t, ent_i_t, lit_t,
      w_er_t, w_lr_t, b_r_t, w_ei_t, w_li_t, b_i_t)

    return pred[:B, :N]


def complex_literal_forward(e1, rel, params, *, table_dtype=jnp.float32):
    """Forward pass. Set table_dtype=jnp.bfloat16 to halve streamed HBM bytes."""
    N, E = params["emb_e_real"].shape
    L = params["num_lit"].shape[1]
    B = int(e1.size)

    e_pad = _round_up(E, 128)
    l_pad = _round_up(max(L, 1), 8)
    n_pad = _round_up(N, 128)
    b_pad = _round_up(max(B, 1), 8)
    if b_pad > 256:
        tile_b = 256
        b_pad = _round_up(b_pad, 256)
    else:
        tile_b = b_pad

    vmem_limit = _vmem_limit_bytes()
    tile_n = _pick_tile_n(n_pad, tile_b, e_pad, l_pad,
                          jnp.dtype(table_dtype).itemsize, vmem_limit)

    return _forward_impl(e1, rel, params,
                         tile_b=tile_b, tile_n=tile_n,
                         e_pad=e_pad, l_pad=l_pad, n_pad=n_pad, b_pad=b_pad,
                         vmem_limit_bytes=vmem_limit, table_dtype=table_dtype)


# ----------------------------- reference -------------------------------------


def _reference_forward(e1, rel, params):
    p = params
    e1_idx = e1.reshape(-1)
    rel_idx = rel.reshape(-1)
    e1r = p["emb_e_real"][e1_idx]
    e1i = p["emb_e_img"][e1_idx]
    relr = p["emb_rel_real"][rel_idx]
    reli = p["emb_rel_img"][rel_idx]
    lit1 = p["num_lit"][e1_idx]

    def gate(emb, lit, We, Wl, b):
        return jnp.tanh(emb @ We + lit @ Wl + b)

    e1gr = gate(e1r, lit1, p["W_er"], p["W_lr"], p["b_r"])
    e1gi = gate(e1i, lit1, p["W_ei"], p["W_li"], p["b_i"])
    e2r = gate(p["emb_e_real"], p["num_lit"], p["W_er"], p["W_lr"], p["b_r"])
    e2i = gate(p["emb_e_img"], p["num_lit"], p["W_ei"], p["W_li"], p["b_i"])

    pred = ((e1gr * relr) @ e2r.T + (e1gr * reli) @ e2i.T
            + (e1gi * relr) @ e2i.T - (e1gi * reli) @ e2r.T)
    return jax.nn.sigmoid(pred)


# ----------------------------- main -------------------------------------------


def _make_params(key, num_entities, num_relations, emb_dim, n_lit):
    ks = jax.random.split(key, 11)
    xav_std = lambda fi, fo: (2.0 / (fi + fo)) ** 0.5

    def emb(k, n):
        w = jax.random.normal(k, (n, emb_dim), jnp.float32) * xav_std(n, emb_dim)
        return w.at[0].set(0.0)  # padding_idx=0 row

    return {
        "emb_e_real": emb(ks[0], num_entities),
        "emb_e_img": emb(ks[1], num_entities),
        "emb_rel_real": emb(ks[2], num_relations),
        "emb_rel_img": emb(ks[3], num_relations),
        "num_lit": jax.random.uniform(ks[4], (num_entities, n_lit), jnp.float32),
        # Linear(E + L -> E), split into the E-part and L-part of the weight.
        "W_er": jax.random.normal(ks[5], (emb_dim, emb_dim), jnp.float32)
                * xav_std(emb_dim + n_lit, emb_dim),
        "W_lr": jax.random.normal(ks[6], (n_lit, emb_dim), jnp.float32)
                * xav_std(emb_dim + n_lit, emb_dim),
        "b_r": jnp.zeros((1, emb_dim), jnp.float32),
        "W_ei": jax.random.normal(ks[7], (emb_dim, emb_dim), jnp.float32)
                * xav_std(emb_dim + n_lit, emb_dim),
        "W_li": jax.random.normal(ks[8], (n_lit, emb_dim), jnp.float32)
                * xav_std(emb_dim + n_lit, emb_dim),
        "b_i": jnp.zeros((1, emb_dim), jnp.float32),
    }


if __name__ == "__main__":
    key = jax.random.PRNGKey(0)
    num_entities = 256
    num_relations = 16
    emb_dim = 32
    n_lit = 8
    batch = 2

    pkey, ikey, rkey = jax.random.split(key, 3)
    params = _make_params(pkey, num_entities, num_relations, emb_dim, n_lit)

    e1 = jax.random.randint(ikey, (batch, 1), 0, num_entities, jnp.int32)
    rel = jax.random.randint(rkey, (batch, 1), 0, num_relations, jnp.int32)

    ref = _reference_forward(e1, rel, params)

    # Full-precision streamed tables: tight check vs the f32 reference.
    pred = jax.block_until_ready(complex_literal_forward(e1, rel, params))
    assert pred.shape == (batch, num_entities)
    assert jnp.allclose(pred, ref, atol=1e-4, rtol=1e-4), "f32 mismatch vs reference"

    # bf16-streamed tables (halves HBM traffic of the entity scan), f32 accumulation.
    pred_bf16 = jax.block_until_ready(
        complex_literal_forward(e1, rel, params, table_dtype=jnp.bfloat16))
    assert pred_bf16.shape == (batch, num_entities)
    assert jnp.allclose(pred_bf16, ref, atol=3e-2, rtol=3e-2), "bf16 mismatch vs reference"

    print("KERNEL_OK")
</pallas_src>

<mosaic_0001>
module attributes {stable_mosaic.version = 11 : i64} {
  func.func @_score_kernel(%arg0: i32, %arg1: i32, %arg2: memref<8x128xf32, #tpu.memory_space<vmem>>, %arg3: memref<8x128xf32, #tpu.memory_space<vmem>>, %arg4: memref<128x128xf32, #tpu.memory_space<vmem>>, %arg5: memref<128x128xf32, #tpu.memory_space<vmem>>, %arg6: memref<8x128xf32, #tpu.memory_space<vmem>>, %arg7: memref<128x128xf32, #tpu.memory_space<vmem>>, %arg8: memref<128x8xf32, #tpu.memory_space<vmem>>, %arg9: memref<128x1xf32, #tpu.memory_space<vmem>>, %arg10: memref<128x128xf32, #tpu.memory_space<vmem>>, %arg11: memref<128x8xf32, #tpu.memory_space<vmem>>, %arg12: memref<128x1xf32, #tpu.memory_space<vmem>>, %arg13: memref<8x128xf32, #tpu.memory_space<vmem>>) attributes {dimension_semantics = [#tpu.dimension_semantics<parallel>, #tpu.dimension_semantics<parallel>], iteration_bounds = array<i64: 1, 2>, scalar_prefetch = 0 : i64, scratch_operands = 0 : i64, tpu.core_type = #tpu.core_type<tc>, window_params = [{transform_indices = @transform_0, window_bounds = array<i64: 8, 128>}, {transform_indices = @transform_1, window_bounds = array<i64: 8, 128>}, {transform_indices = @transform_2, window_bounds = array<i64: 128, 128>}, {transform_indices = @transform_3, window_bounds = array<i64: 128, 128>}, {transform_indices = @transform_4, window_bounds = array<i64: 8, 128>}, {pipeline_mode = #tpu.pipeline_mode<synchronous>, transform_indices = @transform_5, window_bounds = array<i64: 128, 128>}, {pipeline_mode = #tpu.pipeline_mode<synchronous>, transform_indices = @transform_6, window_bounds = array<i64: 128, 8>}, {pipeline_mode = #tpu.pipeline_mode<synchronous>, transform_indices = @transform_7, window_bounds = array<i64: 128, 1>}, {pipeline_mode = #tpu.pipeline_mode<synchronous>, transform_indices = @transform_8, window_bounds = array<i64: 128, 128>}, {pipeline_mode = #tpu.pipeline_mode<synchronous>, transform_indices = @transform_9, window_bounds = array<i64: 128, 8>}, {pipeline_mode = #tpu.pipeline_mode<synchronous>, transform_indices = @transform_10, window_bounds = array<i64: 128, 1>}, {transform_indices = @transform_11, window_bounds = array<i64: 8, 128>}]} {
    %c0 = arith.constant 0 : index
    %c0_0 = arith.constant 0 : index
    %0 = vector.load %arg6[%c0, %c0_0] : memref<8x128xf32, #tpu.memory_space<vmem>>, vector<8x128xf32>
    %c0_1 = arith.constant 0 : index
    %c0_2 = arith.constant 0 : index
    %1 = vector.load %arg7[%c0_1, %c0_2] : memref<128x128xf32, #tpu.memory_space<vmem>>, vector<128x128xf32>
    %c0_3 = arith.constant 0 : index
    %c0_4 = arith.constant 0 : index
    %2 = vector.load %arg4[%c0_3, %c0_4] : memref<128x128xf32, #tpu.memory_space<vmem>>, vector<128x128xf32>
    %cst = arith.constant dense<0.000000e+00> : vector<128x128xf32>
    %3 = tpu.matmul %1, %2, %cst {dimension_numbers = #tpu.dot_dimension_numbers<[1], [0], [0], [1], [0, 0, 1, 1], [], []>} : vector<128x128xf32>, vector<128x128xf32>, vector<128x128xf32> -> vector<128x128xf32>
    %c0_5 = arith.constant 0 : index
    %c0_6 = arith.constant 0 : index
    %4 = vector.load %arg8[%c0_5, %c0_6] : memref<128x8xf32, #tpu.memory_space<vmem>>, vector<128x8xf32>
    %cst_7 = arith.constant dense<0.000000e+00> : vector<128x128xf32>
    %5 = tpu.matmul %4, %0, %cst_7 {dimension_numbers = #tpu.dot_dimension_numbers<[1], [0], [0], [1], [0, 0, 1, 1], [], []>} : vector<128x8xf32>, vector<8x128xf32>, vector<128x128xf32> -> vector<128x128xf32>
    %6 = arith.addf %3, %5 : vector<128x128xf32>
    %c0_8 = arith.constant 0 : index
    %c0_9 = arith.constant 0 : index
    %7 = vector.load %arg9[%c0_8, %c0_9] : memref<128x1xf32, #tpu.memory_space<vmem>>, vector<128x1xf32>
    %8 = vector.broadcast %7 : vector<128x1xf32> to vector<128x128xf32>
    %9 = arith.addf %6, %8 : vector<128x128xf32>
    %10 = math.tanh %9 : vector<128x128xf32>
    %c0_10 = arith.constant 0 : index
    %c0_11 = arith.constant 0 : index
    %11 = vector.load %arg10[%c0_10, %c0_11] : memref<128x128xf32, #tpu.memory_space<vmem>>, vector<128x128xf32>
    %c0_12 = arith.constant 0 : index
    %c0_13 = arith.constant 0 : index
    %12 = vector.load %arg5[%c0_12, %c0_13] : memref<128x128xf32, #tpu.memory_space<vmem>>, vector<128x128xf32>
    %cst_14 = arith.constant dense<0.000000e+00> : vector<128x128xf32>
    %13 = tpu.matmul %11, %12, %cst_14 {dimension_numbers = #tpu.dot_dimension_numbers<[1], [0], [0], [1], [0, 0, 1, 1], [], []>} : vector<128x128xf32>, vector<128x128xf32>, vector<128x128xf32> -> vector<128x128xf32>
    %c0_15 = arith.constant 0 : index
    %c0_16 = arith.constant 0 : index
    %14 = vector.load %arg11[%c0_15, %c0_16] : memref<128x8xf32, #tpu.memory_space<vmem>>, vector<128x8xf32>
    %cst_17 = arith.constant dense<0.000000e+00> : vector<128x128xf32>
    %15 = tpu.matmul %14, %0, %cst_17 {dimension_numbers = #tpu.dot_dimension_numbers<[1], [0], [0], [1], [0, 0, 1, 1], [], []>} : vector<128x8xf32>, vector<8x128xf32>, vector<128x128xf32> -> vector<128x128xf32>
    %16 = arith.addf %13, %15 : vector<128x128xf32>
    %c0_18 = arith.constant 0 : index
    %c0_19 = arith.constant 0 : index
    %17 = vector.load %arg12[%c0_18, %c0_19] : memref<128x1xf32, #tpu.memory_space<vmem>>, vector<128x1xf32>
    %18 = vector.broadcast %17 : vector<128x1xf32> to vector<128x128xf32>
    %19 = arith.addf %16, %18 : vector<128x128xf32>
    %20 = math.tanh %19 : vector<128x128xf32>
    %c0_20 = arith.constant 0 : index
    %c0_21 = arith.constant 0 : index
    %21 = vector.load %arg2[%c0_20, %c0_21] : memref<8x128xf32, #tpu.memory_space<vmem>>, vector<8x128xf32>
    %cst_22 = arith.constant dense<0.000000e+00> : vector<8x128xf32>
    %22 = tpu.matmul %21, %10, %cst_22 {dimension_numbers = #tpu.dot_dimension_numbers<[1], [0], [0], [1], [0, 0, 1, 1], [], []>} : vector<8x128xf32>, vector<128x128xf32>, vector<8x128xf32> -> vector<8x128xf32>
    %c0_23 = arith.constant 0 : index
    %c0_24 = arith.constant 0 : index
    %23 = vector.load %arg3[%c0_23, %c0_24] : memref<8x128xf32, #tpu.memory_space<vmem>>, vector<8x128xf32>
    %cst_25 = arith.constant dense<0.000000e+00> : vector<8x128xf32>
    %24 = tpu.matmul %23, %20, %cst_25 {dimension_numbers = #tpu.dot_dimension_numbers<[1], [0], [0], [1], [0, 0, 1, 1], [], []>} : vector<8x128xf32>, vector<128x128xf32>, vector<8x128xf32> -> vector<8x128xf32>
    %25 = arith.addf %22, %24 : vector<8x128xf32>
    %26 = arith.negf %25 : vector<8x128xf32>
    %27 = math.exp %26 : vector<8x128xf32>
    %cst_26 = arith.constant 1.000000e+00 : f32
    %28 = vector.broadcast %cst_26 : f32 to vector<8x128xf32>
    %29 = arith.addf %28, %27 : vector<8x128xf32>
    %30 = arith.divf %28, %29 : vector<8x128xf32>
    %c0_27 = arith.constant 0 : index
    %c0_28 = arith.constant 0 : index
    %31 = vector.load %arg13[%c0_27, %c0_28] : memref<8x128xf32, #tpu.memory_space<vmem>>, vector<8x128xf32>
    tpu.vector_store %arg13[%c0_27, %c0_28], %30 {strides = array<i32>} : memref<8x128xf32, #tpu.memory_space<vmem>>, vector<8x128xf32>,
    return
  }
  func.func @transform_0(%arg0: i32, %arg1: i32) -> (i32, i32) {
    %c0_i32 = arith.constant 0 : i32
    %c0_i32_0 = arith.constant 0 : i32
    return %arg0, %c0_i32 : i32, i32
  }
  func.func @transform_1(%arg0: i32, %arg1: i32) -> (i32, i32) {
    %c0_i32 = arith.constant 0 : i32
    %c0_i32_0 = arith.constant 0 : i32
    return %arg0, %c0_i32 : i32, i32
  }
  func.func @transform_2(%arg0: i32, %arg1: i32) -> (i32, i32) {
    %c0_i32 = arith.constant 0 : i32
    %c0_i32_0 = arith.constant 0 : i32
    return %c0_i32, %arg1 : i32, i32
  }
  func.func @transform_3(%arg0: i32, %arg1: i32) -> (i32, i32) {
    %c0_i32 = arith.constant 0 : i32
    %c0_i32_0 = arith.constant 0 : i32
    return %c0_i32, %arg1 : i32, i32
  }
  func.func @transform_4(%arg0: i32, %arg1: i32) -> (i32, i32) {
    %c0_i32 = arith.constant 0 : i32
    %c0_i32_0 = arith.constant 0 : i32
    return %c0_i32, %arg1 : i32, i32
  }
  func.func @transform_5(%arg0: i32, %arg1: i32) -> (i32, i32) {
    %c0_i32 = arith.constant 0 : i32
    %c0_i32_0 = arith.constant 0 : i32
    %c0_i32_1 = arith.constant 0 : i32
    return %c0_i32, %c0_i32_0 : i32, i32
  }
  func.func @transform_6(%arg0: i32, %arg1: i32) -> (i32, i32) {
    %c0_i32 = arith.constant 0 : i32
    %c0_i32_0 = arith.constant 0 : i32
    %c0_i32_1 = arith.constant 0 : i32
    return %c0_i32, %c0_i32_0 : i32, i32
  }
  func.func @transform_7(%arg0: i32, %arg1: i32) -> (i32, i32) {
    %c0_i32 = arith.constant 0 : i32
    %c0_i32_0 = arith.constant 0 : i32
    %c0_i32_1 = arith.constant 0 : i32
    return %c0_i32, %c0_i32_0 : i32, i32
  }
  func.func @transform_8(%arg0: i32, %arg1: i32) -> (i32, i32) {
    %c0_i32 = arith.constant 0 : i32
    %c0_i32_0 = arith.constant 0 : i32
    %c0_i32_1 = arith.constant 0 : i32
    return %c0_i32, %c0_i32_0 : i32, i32
  }
  func.func @transform_9(%arg0: i32, %arg1: i32) -> (i32, i32) {
    %c0_i32 = arith.constant 0 : i32
    %c0_i32_0 = arith.constant 0 : i32
    %c0_i32_1 = arith.constant 0 : i32
    return %c0_i32, %c0_i32_0 : i32, i32
  }
  func.func @transform_10(%arg0: i32, %arg1: i32) -> (i32, i32) {
    %c0_i32 = arith.constant 0 : i32
    %c0_i32_0 = arith.constant 0 : i32
    %c0_i32_1 = arith.constant 0 : i32
    return %c0_i32, %c0_i32_0 : i32, i32
  }
  func.func @transform_11(%arg0: i32, %arg1: i32) -> (i32, i32) {
    %c0_i32 = arith.constant 0 : i32
    return %arg0, %arg1 : i32, i32
  }
}

</mosaic_0001>

<bundles_post_ra>
// kernel: _forward_impl.1
= control target key start
LH: loop header
LB: loop body
LE: loop exit
PB: predicated region body
PF: predicated region fallthrough
CT: control target
= control target key end

     0   :  { %s2768_s17 = smov 0   ;;  %s2770_s18 = smov 0   ;;  %s3310_s0 = inlined_call_operand.vmem [shape: f32[8,128], index: 0, kind: input, shape index: {}]   ;;  %s3311_s1 = inlined_call_operand.vmem [shape: f32[8,128], index: 1, kind: input, shape index: {}]   ;;  %s3312_s2 = inlined_call_operand.vmem [shape: f32[128,256], index: 2, kind: input, shape index: {}]   ;;  %s3313_s3 = inlined_call_operand.vmem [shape: f32[128,256], index: 3, kind: input, shape index: {}]   ;;  %s3314_s4 = inlined_call_operand.vmem [shape: f32[8,256], index: 4, kind: input, shape index: {}]   ;;  %s3315_s5 = inlined_call_operand.vmem [shape: f32[128,128], index: 5, kind: input, shape index: {}]   ;;  %s3316_s6 = inlined_call_operand.vmem [shape: f32[128,8], index: 6, kind: input, shape index: {}]   ;;  %s3317_s7 = inlined_call_operand.vmem [shape: f32[128,1], index: 7, kind: input, shape index: {}]   ;;  %s3318_s8 = inlined_call_operand.vmem [shape: f32[128,128], index: 8, kind: input, shape index: {}]   ;;  %s3319_s9 = inlined_call_operand.vmem [shape: f32[128,8], index: 9, kind: input, shape index: {}]   ;;  %s3320_s10 = inlined_call_operand.vmem [shape: f32[128,1], index: 10, kind: input, shape index: {}]   ;;  %s3321_s11 = inlined_call_operand.vmem [shape: f32[8,256], index: 11, kind: output, shape index: {}]  }
   0x1   :  { %s2772_s19 = smov 0   ;;  %s2774_s20 = smov 0  }
   0x2   :  { %s2776_s21 = smov 0  }
   0x3 LB: > { %s30_s22 = sadd.s32 1, %s2698_s20  ;;  %p99_p1 = scmp.ne.s32.totalorder %s2690_s18, %s2686_s17  ;;  %s2702_s21 = sphi %s2776_s21, %s21_s21   ;;  %s2698_s20 = sphi %s2774_s20, %s3326_s20   ;;  %s2694_s19 = sphi %s2772_s19, %s3325_s19   ;;  %s2690_s18 = sphi %s2770_s18, %s3324_s18   ;;  %s2686_s17 = sphi %s2768_s17, %s3323_s17  }
   0x4   : > { %p31_p0 = scmp.ge.s32.totalorder %s30_s22, 2  ;;  %p100_p2 = scmp.eq.s32.totalorder %s2702_s21, 0 }
   0x5   : > { %s92_s25 = sadd.s32 1, %s2690_s18  ;;  %p1994_p5 = scmp.ge.s32.totalorder %s2702_s21, 2 }
   0x6   : > { %s3328_s22 = smov (%p31_p0, %s30_s22), 0  ;;  %p2799_p3 = por %p100_p2, %p99_p1 }
   0x7   : > { %s89_s24 = ssub.s32 %s2698_s20, %s3328_s22  ;;  %363 = sbr.rel (%p1994_p5) target bundleno = 38 (0x26), region = 48 }
   0x8   : > { %p90_p4 = scmp.eq.s32.totalorder %s89_s24, 0 }
   0xa   : > { %s2807_s26 = scalar_select %p90_p4, %s2690_s18, %s92_s25  }
   0xe   : > { %366 = sbr.rel (!%p2799_p3) target bundleno = 26 (0x1a), region = 52  ;;  %s368_s27 = sand.u32 (%p2799_p3), 1, %s2690_s18  }
   0xf   : > { %s1996_s28 = sshll.u32 (%p2799_p3), %s2698_s20, 3  ;;  %s1995_s29 = sshll.u32 (%p2799_p3), %s368_s27, 7 }
  0x10   : > { %s2817_s13 = scalar_lea.vmem (%p2799_p3), %s3312_s2, %s1996_s28  ;;  %s370_s14 = scalar_lea.vmem (%p2799_p3), [#allocation2], %s1995_s29 }
  0x11   : > { %v430_v0 = vld [vmem:[%s2817_s13] sm:$0xff] (%p2799_p3)  ;;  %v432_v1 = vld [vmem:[%s2817_s13 + $0x10] sm:$0xff] (%p2799_p3) }
  0x12   : > { %v434_v2 = vld [vmem:[%s2817_s13 + $0x20] sm:$0xff] (%p2799_p3)  ;;  %431 = vst [vmem:[%s370_s14] sm:$0xff] (%p2799_p3), %v430_v0  ;;  %433 = vst [vmem:[%s370_s14 + $0x8] sm:$0xff] (%p2799_p3), %v432_v1  ;;  %v436_v3 = vld [vmem:[%s2817_s13 + $0x30] sm:$0xff] (%p2799_p3) }
  0x13   : > { %435 = vst [vmem:[%s370_s14 + $0x10] sm:$0xff] (%p2799_p3), %v434_v2  ;;  %v438_v4 = vld [vmem:[%s2817_s13 + $0x40] sm:$0xff] (%p2799_p3)  ;;  %v440_v5 = vld [vmem:[%s2817_s13 + $0x50] sm:$0xff] (%p2799_p3)  ;;  %437 = vst [vmem:[%s370_s14 + $0x18] sm:$0xff] (%p2799_p3), %v436_v3 }
  0x14   : > { %439 = vst [vmem:[%s370_s14 + $0x20] sm:$0xff] (%p2799_p3), %v438_v4  ;;  %441 = vst [vmem:[%s370_s14 + $0x28] sm:$0xff] (%p2799_p3), %v440_v5  ;;  %v442_v6 = vld [vmem:[%s2817_s13 + $0x60] sm:$0xff] (%p2799_p3)  ;;  %v444_v7 = vld [vmem:[%s2817_s13 + $0x70] sm:$0xff] (%p2799_p3) }
  0x15   : > { %v446_v8 = vld [vmem:[%s2817_s13 + $0x80] sm:$0xff]  ;;  %443 = vst [vmem:[%s370_s14 + $0x30] sm:$0xff] %v442_v6  ;;  %445 = vst [vmem:[%s370_s14 + $0x38] sm:$0xff] %v444_v7  ;;  %v448_v9 = vld [vmem:[%s2817_s13 + $0x90] sm:$0xff] }
  0x16   : > { %447 = vst [vmem:[%s370_s14 + $0x40] sm:$0xff] %v446_v8  ;;  %v450_v10 = vld [vmem:[%s2817_s13 + $0xa0] sm:$0xff]  ;;  %v452_v11 = vld [vmem:[%s2817_s13 + $0xb0] sm:$0xff]  ;;  %449 = vst [vmem:[%s370_s14 + $0x48] sm:$0xff] %v448_v9 }
  0x17   : > { %451 = vst [vmem:[%s370_s14 + $0x50] sm:$0xff] %v450_v10  ;;  %453 = vst [vmem:[%s370_s14 + $0x58] sm:$0xff] %v452_v11  ;;  %v454_v12 = vld [vmem:[%s2817_s13 + $0xc0] sm:$0xff]  ;;  %v456_v13 = vld [vmem:[%s2817_s13 + $0xd0] sm:$0xff] }
  0x18   : > { %v458_v14 = vld [vmem:[%s2817_s13 + $0xe0] sm:$0xff]  ;;  %455 = vst [vmem:[%s370_s14 + $0x60] sm:$0xff] %v454_v12  ;;  %457 = vst [vmem:[%s370_s14 + $0x68] sm:$0xff] %v456_v13  ;;  %v460_v15 = vld [vmem:[%s2817_s13 + $0xf0] sm:$0xff] }
  0x19   : > { %459 = vst [vmem:[%s370_s14 + $0x70] sm:$0xff] %v458_v14  ;;  %461 = vst [vmem:[%s370_s14 + $0x78] sm:$0xff] %v460_v15 }
  0x1a PF: > { %467 = sbr.rel (!%p2799_p3) target bundleno = 38 (0x26), region = 90  ;;  %s469_s15 = sand.u32 (%p2799_p3), 1, %s2690_s18  }
  0x1b   : > { %s1998_s16 = sshll.u32 (%p2799_p3), %s2698_s20, 3  ;;  %s1997_s24 = sshll.u32 (%p2799_p3), %s469_s15, 7 }
  0x1c   : > { %s2842_s28 = scalar_lea.vmem (%p2799_p3), %s3313_s3, %s1998_s16  ;;  %s471_s23 = scalar_lea.vmem (%p2799_p3), [#allocation3], %s1997_s24 }
  0x1d   : > { %v531_v16 = vld [vmem:[%s2842_s28] sm:$0xff] (%p2799_p3)  ;;  %v533_v17 = vld [vmem:[%s2842_s28 + $0x10] sm:$0xff] (%p2799_p3) }
  0x1e   : > { %v535_v18 = vld [vmem:[%s2842_s28 + $0x20] sm:$0xff] (%p2799_p3)  ;;  %532 = vst [vmem:[%s471_s23] sm:$0xff] (%p2799_p3), %v531_v16  ;;  %534 = vst [vmem:[%s471_s23 + $0x8] sm:$0xff] (%p2799_p3), %v533_v17  ;;  %v537_v19 = vld [vmem:[%s2842_s28 + $0x30] sm:$0xff] (%p2799_p3) }
  0x1f   : > { %536 = vst [vmem:[%s471_s23 + $0x10] sm:$0xff] (%p2799_p3), %v535_v18  ;;  %v539_v20 = vld [vmem:[%s2842_s28 + $0x40] sm:$0xff] (%p2799_p3)  ;;  %v541_v21 = vld [vmem:[%s2842_s28 + $0x50] sm:$0xff] (%p2799_p3)  ;;  %538 = vst [vmem:[%s471_s23 + $0x18] sm:$0xff] (%p2799_p3), %v537_v19 }
  0x20   : > { %540 = vst [vmem:[%s471_s23 + $0x20] sm:$0xff] (%p2799_p3), %v539_v20  ;;  %542 = vst [vmem:[%s471_s23 + $0x28] sm:$0xff] (%p2799_p3), %v541_v21  ;;  %v543_v22 = vld [vmem:[%s2842_s28 + $0x60] sm:$0xff] (%p2799_p3)  ;;  %v545_v23 = vld [vmem:[%s2842_s28 + $0x70] sm:$0xff] (%p2799_p3) }
  0x21   : > { %v547_v24 = vld [vmem:[%s2842_s28 + $0x80] sm:$0xff]  ;;  %544 = vst [vmem:[%s471_s23 + $0x30] sm:$0xff] %v543_v22  ;;  %546 = vst [vmem:[%s471_s23 + $0x38] sm:$0xff] %v545_v23  ;;  %v549_v25 = vld [vmem:[%s2842_s28 + $0x90] sm:$0xff] }
  0x22   : > { %548 = vst [vmem:[%s471_s23 + $0x40] sm:$0xff] %v547_v24  ;;  %v551_v26 = vld [vmem:[%s2842_s28 + $0xa0] sm:$0xff]  ;;  %v553_v27 = vld [vmem:[%s2842_s28 + $0xb0] sm:$0xff]  ;;  %550 = vst [vmem:[%s471_s23 + $0x48] sm:$0xff] %v549_v25 }
  0x23   : > { %552 = vst [vmem:[%s471_s23 + $0x50] sm:$0xff] %v551_v26  ;;  %554 = vst [vmem:[%s471_s23 + $0x58] sm:$0xff] %v553_v27  ;;  %v555_v28 = vld [vmem:[%s2842_s28 + $0xc0] sm:$0xff]  ;;  %v557_v29 = vld [vmem:[%s2842_s28 + $0xd0] sm:$0xff] }
  0x24   : > { %v559_v30 = vld [vmem:[%s2842_s28 + $0xe0] sm:$0xff]  ;;  %556 = vst [vmem:[%s471_s23 + $0x60] sm:$0xff] %v555_v28  ;;  %558 = vst [vmem:[%s471_s23 + $0x68] sm:$0xff] %v557_v29  ;;  %v561_v31 = vld [vmem:[%s2842_s28 + $0xf0] sm:$0xff] }
  0x25   : > { %560 = vst [vmem:[%s471_s23 + $0x70] sm:$0xff] %v559_v30  ;;  %562 = vst [vmem:[%s471_s23 + $0x78] sm:$0xff] %v561_v31 }
  0x26 PF: > { %p1999_p6 = scmp.ge.s32.totalorder %s2702_s21, 1  ;;  %p574_p7 = scmp.lt.s32.totalorder %s2702_s21, 3 }
  0x28   : > { %p575_p8 = pnand %p1999_p6, %p574_p7 }
  0x29   : > { %p654_p9 = scmp.lt.s32.totalorder (!%p575_p8), %s2694_s19, 1  ;;  %v699_v32 = vld [vmem:[%s3316_s6] sm:$0xff] (!%p575_p8)  ;;  %vm715_vm0 = vcmask (!%p575_p8), 64512   ;;  %s581_s14 = sand.u32 (!%p575_p8), 1, %s2686_s17   ;;  %v2704_v34 = vmov (!%p575_p8), 0   ;;  %v700_v38 = vld [vmem:[%s3316_s6 + $0x8] sm:$0xff] (!%p575_p8) }
  0x2a   : > { %578 = sbr.rel (%p575_p8) target bundleno = 594 (0x252), region = 132  ;;  %v1214_v33 = vld [vmem:[%s3319_s9] sm:$0xff] (!%p575_p8)  ;;  %2173 = vmatprep.mubr.msk.f32.mxu0 (!%p575_p8), %vm715_vm0, %v699_v32  ;;  %s2000_s15 = sshll.u32 (!%p575_p8), %s581_s14, 7  ;;  %2595 = vset.pattern.permute.xlu1 (!%p575_p8), %v2704_v34  ;;  %v1215_v45 = vld [vmem:[%s3319_s9 + $0x8] sm:$0xff] (!%p575_p8)  ;;  %v701_v48 = vld [vmem:[%s3316_s6 + $0x10] sm:$0xff] (!%p575_p8)  ;;  %vm2706_vm1 = vmmov (!%p575_p8), 0  }
  0x2b   : > { %2255 = vmatprep.mubr.msk.f32.mxu1 (!%p575_p8), %vm715_vm0, %v1214_v33  ;;  %2594 = vset.pattern.permute.xlu0 (!%p575_p8), %v2704_v34  ;;  %s2876_s24 = scalar_lea.vmem (!%p575_p8), [#allocation2], %s2000_s15  ;;  %s2880_s17 = scalar_lea.vmem (!%p575_p8), [#allocation3], %s2000_s15  ;;  %v1216_v49 = vld [vmem:[%s3319_s9 + $0x10] sm:$0xff] (!%p575_p8)  ;;  %v702_v51 = vld [vmem:[%s3316_s6 + $0x18] sm:$0xff] (!%p575_p8)  ;;  %v703_v58 = vld [vmem:[%s3316_s6 + $0x20] sm:$0xff] (!%p575_p8) }
  0x2c   : > { %v683_v35 = vld [vmem:[%s2876_s24] sm:$0xff] (!%p575_p8)  ;;  %v684_v36 = vld [vmem:[%s2876_s24 + $0x8] sm:$0xff] (!%p575_p8)  ;;  %v685_v43 = vld [vmem:[%s2876_s24 + $0x10] sm:$0xff] (!%p575_p8) }
  0x2d   : > { %v1198_v37 = vld [vmem:[%s2880_s17] sm:$0xff] (!%p575_p8)  ;;  %v2405_v39 = vpack.c.bf16 (!%p575_p8), %v684_v36, %v683_v35  ;;  %v1199_v40 = vld [vmem:[%s2880_s17 + $0x8] sm:$0xff] (!%p575_p8)  ;;  %v686_v44 = vld [vmem:[%s2876_s24 + $0x18] sm:$0xff] (!%p575_p8) }
  0x2e   : > { %v2437_v42 = vpack.c.bf16 (!%p575_p8), %v1199_v40, %v1198_v37  ;;  %v1200_v46 = vld [vmem:[%s2880_s17 + $0x10] sm:$0xff] (!%p575_p8)  ;;  %v1201_v47 = vld [vmem:[%s2880_s17 + $0x18] sm:$0xff] (!%p575_p8)  ;;  %v2409_v50 = vpack.c.bf16 (!%p575_p8), %v686_v44, %v685_v43  ;;  %v687_v53 = vld [vmem:[%s2876_s24 + $0x20] sm:$0xff] (!%p575_p8) }
  0x2f   : > { %v2441_v52 = vpack.c.bf16 (!%p575_p8), %v1201_v47, %v1200_v46  ;;  %v688_v54 = vld [vmem:[%s2876_s24 + $0x28] sm:$0xff] (!%p575_p8)  ;;  %v1217_v55 = vld [vmem:[%s3319_s9 + $0x18] sm:$0xff] (!%p575_p8)  ;;  %v1202_v56 = vld [vmem:[%s2880_s17 + $0x20] sm:$0xff] (!%p575_p8) }
  0x30   : > { %v1203_v57 = vld [vmem:[%s2880_s17 + $0x28] sm:$0xff] (!%p575_p8)  ;;  %v1218_v59 = vld [vmem:[%s3319_s9 + $0x20] sm:$0xff] (!%p575_p8)  ;;  %v2413_v60 = vpack.c.bf16 (!%p575_p8), %v688_v54, %v687_v53  ;;  %v689_v63 = vld [vmem:[%s2876_s24 + $0x30] sm:$0xff] (!%p575_p8) }
  0x31   : > { %s3330_s19 = smov (!%p654_p9, %s2694_s19), 1  ;;  %v704_v61 = vld [vmem:[%s3316_s6 + $0x28] sm:$0xff]  ;;  %v2445_v62 = vpack.c.bf16 %v1203_v57, %v1202_v56  ;;  %v690_v0 = vld [vmem:[%s2876_s24 + $0x38] sm:$0xff]  ;;  %v1204_v2 = vld [vmem:[%s2880_s17 + $0x30] sm:$0xff] }
  0x32   : > { %s2002_s16 = sshll.u32 %s3330_s19, 3  ;;  %v1219_v1 = vld [vmem:[%s3319_s9 + $0x28] sm:$0xff]  ;;  %v1205_v3 = vld [vmem:[%s2880_s17 + $0x38] sm:$0xff]  ;;  %v705_v4 = vld [vmem:[%s3316_s6 + $0x30] sm:$0xff]  ;;  %v2417_v6 = vpack.c.bf16 %v690_v0, %v689_v63 }
  0x33   : > { %s657_s28 = scalar_lea.vmem %s3314_s4, %s2002_s16  ;;  %v1220_v5 = vld [vmem:[%s3319_s9 + $0x30] sm:$0xff]  ;;  %v706_v7 = vld [vmem:[%s3316_s6 + $0x38] sm:$0xff]  ;;  %v2449_v8 = vpack.c.bf16 %v1205_v3, %v1204_v2  ;;  %v691_v9 = vld [vmem:[%s2876_s24 + $0x40] sm:$0xff] }
  0x34   : > { %v666_v41 = vld [vmem:[%s657_s28] sm:$0xff]  ;;  %v692_v10 = vld [vmem:[%s2876_s24 + $0x48] sm:$0xff]  ;;  %v1221_v11 = vld [vmem:[%s3319_s9 + $0x38] sm:$0xff] }
  0x35   : > { %2171 = vmatprep.subr.mxu0 %v666_v41  ;;  %2253 = vmatprep.subr.mxu1 %v666_v41  ;;  %v1206_v12 = vld [vmem:[%s2880_s17 + $0x40] sm:$0xff]  ;;  %v1207_v13 = vld [vmem:[%s2880_s17 + $0x48] sm:$0xff]  ;;  %v2421_v16 = vpack.c.bf16 %v692_v10, %v691_v9  ;;  %v693_v19 = vld [vmem:[%s2876_s24 + $0x50] sm:$0xff] }
  0x36   : > { %2172 = vmatpush3.msra.mxu0 %v666_v41  ;;  %2254 = vmatpush3.msra.mxu1 %v666_v41  ;;  %v707_v14 = vld [vmem:[%s3316_s6 + $0x40] sm:$0xff]  ;;  %v708_v17 = vld [vmem:[%s3316_s6 + $0x48] sm:$0xff]  ;;  %v2453_v18 = vpack.c.bf16 %v1207_v13, %v1206_v12  ;;  %v694_v20 = vld [vmem:[%s2876_s24 + $0x58] sm:$0xff] }
  0x37   : > { %2174 = vmatmul.mubr.msk.f32.vlgmr.msra.gmra.mrb[0].mxu0 %vm715_vm0, %v700_v38  ;;  %2406 = vmatprep.subr.bf16.mxu0 %v2405_v39  ;;  %v1222_v15 = vld [vmem:[%s3319_s9 + $0x40] sm:$0xff]  ;;  %v1223_v21 = vld [vmem:[%s3319_s9 + $0x48] sm:$0xff]  ;;  %v1208_v22 = vld [vmem:[%s2880_s17 + $0x50] sm:$0xff]  ;;  %v2425_v26 = vpack.c.bf16 %v694_v20, %v693_v19 }
  0x38   : > { %2256 = vmatmul.mubr.msk.f32.vlgmr.msra.gmra.mrb[0].mxu1 %vm715_vm0, %v1215_v45  ;;  %2438 = vmatprep.subr.bf16.mxu1 %v2437_v42  ;;  %v1209_v23 = vld [vmem:[%s2880_s17 + $0x58] sm:$0xff]  ;;  %v709_v24 = vld [vmem:[%s3316_s6 + $0x50] sm:$0xff]  ;;  %v695_v29 = vld [vmem:[%s2876_s24 + $0x60] sm:$0xff] }
  0x39   : > { %2408 = vmatpush3.bf16.msra.mxu0 %v2405_v39  ;;  %2440 = vmatpush3.bf16.msra.mxu1 %v2437_v42  ;;  %v1224_v25 = vld [vmem:[%s3319_s9 + $0x50] sm:$0xff]  ;;  %v710_v27 = vld [vmem:[%s3316_s6 + $0x58] sm:$0xff]  ;;  %v2457_v28 = vpack.c.bf16 %v1209_v23, %v1208_v22  ;;  %v696_v30 = vld [vmem:[%s2876_s24 + $0x68] sm:$0xff] }
  0x3a   : > { %2176 = vmatprep.mubr.msk.f32.mxu0 %vm715_vm0, %v701_v48  ;;  %2258 = vmatprep.mubr.msk.f32.mxu1 %vm715_vm0, %v1216_v49  ;;  %v1225_v31 = vld [vmem:[%s3319_s9 + $0x58] sm:$0xff]  ;;  %v1210_v32 = vld [vmem:[%s2880_s17 + $0x60] sm:$0xff]  ;;  %v1211_v33 = vld [vmem:[%s2880_s17 + $0x68] sm:$0xff]  ;;  %v2429_v36 = vpack.c.bf16 %v696_v30, %v695_v29 }
  0x3b   : > { %2177 = vmatmul.mubr.msk.f32.gmra.mrb[2].mxu0 %vm715_vm0, %v702_v51  ;;  %2410 = vmatprep.subr.bf16.mxu0 %v2409_v50  ;;  %v711_v34 = vld [vmem:[%s3316_s6 + $0x60] sm:$0xff]  ;;  %v712_v37 = vld [vmem:[%s3316_s6 + $0x68] sm:$0xff]  ;;  %v2461_v39 = vpack.c.bf16 %v1211_v33, %v1210_v32  ;;  %v697_v41 = vld [vmem:[%s2876_s24 + $0x70] sm:$0xff] }
  0x3c   : > { %2259 = vmatmul.mubr.msk.f32.gmra.mrb[2].mxu1 %vm715_vm0, %v1217_v55  ;;  %2442 = vmatprep.subr.bf16.mxu1 %v2441_v52  ;;  %v1226_v35 = vld [vmem:[%s3319_s9 + $0x60] sm:$0xff]  ;;  %v1227_v38 = vld [vmem:[%s3319_s9 + $0x68] sm:$0xff]  ;;  %v698_v42 = vld [vmem:[%s2876_s24 + $0x78] sm:$0xff] }
  0x3d   : > { %2412 = vmatpush3.bf16.msra.mxu0 %v2409_v50  ;;  %2444 = vmatpush3.bf16.msra.mxu1 %v2441_v52  ;;  %v1568_v40 = vld [vmem:[%s3320_s10] sm:$0xff]  ;;  %v1212_v44 = vld [vmem:[%s2880_s17 + $0x70] sm:$0xff]  ;;  %v1213_v45 = vld [vmem:[%s2880_s17 + $0x78] sm:$0xff]  ;;  %v2433_v48 = vpack.c.bf16 %v698_v42, %v697_v41  ;;  %s665_s17 = scalar_lea.vmem %s3321_s11, %s2002_s16 }
  0x3e   : > { %2179 = vmatprep.mubr.msk.f32.mxu0 %vm715_vm0, %v703_v58  ;;  %2261 = vmatprep.mubr.msk.f32.mxu1 %vm715_vm0, %v1218_v59  ;;  %v1054_v43 = vld [vmem:[%s3317_s7] sm:$0xff]  ;;  %v713_v46 = vld [vmem:[%s3316_s6 + $0x70] sm:$0xff]  ;;  %v714_v49 = vld [vmem:[%s3316_s6 + $0x78] sm:$0xff]  ;;  %v2465_v50 = vpack.c.bf16 %v1213_v45, %v1212_v44 }
  0x3f   : > { %2180 = vmatmul.mubr.msk.f32.gmra.mrb[4].mxu0 %vm715_vm0, %v704_v61  ;;  %2414 = vmatprep.subr.bf16.mxu0 %v2413_v60  ;;  %v1228_v47 = vld [vmem:[%s3319_s9 + $0x70] sm:$0xff]  ;;  %v1229_v51 = vld [vmem:[%s3319_s9 + $0x78] sm:$0xff]  ;;  %v1569_v52 = vld [vmem:[%s3320_s10 + $0x8] sm:$0xff] }
  0x40   : > { %2262 = vmatmul.mubr.msk.f32.gmra.mrb[4].mxu1 %vm715_vm0, %v1219_v1  ;;  %2446 = vmatprep.subr.bf16.mxu1 %v2445_v62  ;;  %v1055_v53 = vld [vmem:[%s3317_s7 + $0x8] sm:$0xff]  ;;  %v667_v54 = vld [vmem:[%s3315_s5] sm:$0xff]  ;;  %v1057_v58 = vld [vmem:[%s3317_s7 + $0x18] sm:$0xff] }
  0x41   : > { %2416 = vmatpush3.bf16.msra.mxu0 %v2413_v60  ;;  %2448 = vmatpush3.bf16.msra.mxu1 %v2445_v62  ;;  %v1182_v55 = vld [vmem:[%s3318_s8] sm:$0xff]  ;;  %v668_v56 = vld [vmem:[%s3315_s5 + $0x8] sm:$0xff]  ;;  %v1056_v59 = vld [vmem:[%s3317_s7 + $0x10] sm:$0xff] }
  0x42   : > { %2182 = vmatprep.mubr.msk.f32.mxu0 %vm715_vm0, %v705_v4  ;;  %2264 = vmatprep.mubr.msk.f32.mxu1 %vm715_vm0, %v1220_v5  ;;  %v1183_v57 = vld [vmem:[%s3318_s8 + $0x8] sm:$0xff]  ;;  %v669_v60 = vld [vmem:[%s3315_s5 + $0x10] sm:$0xff]  ;;  %v670_v62 = vld [vmem:[%s3315_s5 + $0x18] sm:$0xff] }
  0x43   : > { %2183 = vmatmul.mubr.msk.f32.gmra.mrb[6].mxu0 %vm715_vm0, %v706_v7  ;;  %2418 = vmatprep.subr.bf16.mxu0 %v2417_v6  ;;  %v1184_v61 = vld [vmem:[%s3318_s8 + $0x10] sm:$0xff]  ;;  %v1185_v63 = vld [vmem:[%s3318_s8 + $0x18] sm:$0xff]  ;;  %v671_v2 = vld [vmem:[%s3315_s5 + $0x20] sm:$0xff] }
  0x44   : > { %2265 = vmatmul.mubr.msk.f32.gmra.mrb[6].mxu1 %vm715_vm0, %v1221_v11  ;;  %2450 = vmatprep.subr.bf16.mxu1 %v2449_v8  ;;  %v1571_v0 = vld [vmem:[%s3320_s10 + $0x18] sm:$0xff]  ;;  %v1570_v1 = vld [vmem:[%s3320_s10 + $0x10] sm:$0xff]  ;;  %v1186_v3 = vld [vmem:[%s3318_s8 + $0x20] sm:$0xff] }
  0x45   : > { %2420 = vmatpush3.bf16.msra.mxu0 %v2417_v6  ;;  %2452 = vmatpush3.bf16.msra.mxu1 %v2449_v8  ;;  %v672_v4 = vld [vmem:[%s3315_s5 + $0x28] sm:$0xff]  ;;  %v1058_v7 = vld [vmem:[%s3317_s7 + $0x20] sm:$0xff]  ;;  %v673_v8 = vld [vmem:[%s3315_s5 + $0x30] sm:$0xff] }
  0x46   : > { %2185 = vmatprep.mubr.msk.f32.mxu0 %vm715_vm0, %v707_v14  ;;  %2267 = vmatprep.mubr.msk.f32.mxu1 %vm715_vm0, %v1222_v15  ;;  %v1187_v5 = vld [vmem:[%s3318_s8 + $0x28] sm:$0xff]  ;;  %v1188_v9 = vld [vmem:[%s3318_s8 + $0x30] sm:$0xff]  ;;  %v674_v10 = vld [vmem:[%s3315_s5 + $0x38] sm:$0xff] }
  0x47   : > { %2186 = vmatmul.mubr.msk.f32.gmra.mrb[8].mxu0 %vm715_vm0, %v708_v17  ;;  %2422 = vmatprep.subr.bf16.mxu0 %v2421_v16  ;;  %v1059_v6 = vld [vmem:[%s3317_s7 + $0x28] sm:$0xff]  ;;  %v1189_v11 = vld [vmem:[%s3318_s8 + $0x38] sm:$0xff]  ;;  %v1572_v13 = vld [vmem:[%s3320_s10 + $0x20] sm:$0xff] }
  0x48   : > { %2268 = vmatmul.mubr.msk.f32.gmra.mrb[8].mxu1 %vm715_vm0, %v1223_v21  ;;  %2454 = vmatprep.subr.bf16.mxu1 %v2453_v18  ;;  %v1573_v12 = vld [vmem:[%s3320_s10 + $0x28] sm:$0xff]  ;;  %v675_v14 = vld [vmem:[%s3315_s5 + $0x40] sm:$0xff]  ;;  %v1060_v19 = vld [vmem:[%s3317_s7 + $0x30] sm:$0xff] }
  0x49   : > { %2424 = vmatpush3.bf16.msra.mxu0 %v2421_v16  ;;  %2456 = vmatpush3.bf16.msra.mxu1 %v2453_v18  ;;  %v1190_v15 = vld [vmem:[%s3318_s8 + $0x40] sm:$0xff]  ;;  %v676_v16 = vld [vmem:[%s3315_s5 + $0x48] sm:$0xff]  ;;  %v1061_v18 = vld [vmem:[%s3317_s7 + $0x38] sm:$0xff] }
  0x4a   : > { %2188 = vmatprep.mubr.msk.f32.mxu0 %vm715_vm0, %v709_v24  ;;  %2270 = vmatprep.mubr.msk.f32.mxu1 %vm715_vm0, %v1224_v25  ;;  %v1191_v17 = vld [vmem:[%s3318_s8 + $0x48] sm:$0xff]  ;;  %v677_v20 = vld [vmem:[%s3315_s5 + $0x50] sm:$0xff]  ;;  %v678_v22 = vld [vmem:[%s3315_s5 + $0x58] sm:$0xff] }
  0x4b   : > { %2189 = vmatmul.mubr.msk.f32.gmra.mrb[10].mxu0 %vm715_vm0, %v710_v27  ;;  %2426 = vmatprep.subr.bf16.mxu0 %v2425_v26  ;;  %v1192_v21 = vld [vmem:[%s3318_s8 + $0x50] sm:$0xff]  ;;  %v1193_v23 = vld [vmem:[%s3318_s8 + $0x58] sm:$0xff]  ;;  %v1194_v27 = vld [vmem:[%s3318_s8 + $0x60] sm:$0xff] }
  0x4c   : > { %2271 = vmatmul.mubr.msk.f32.gmra.mrb[10].mxu1 %vm715_vm0, %v1225_v31  ;;  %2458 = vmatprep.subr.bf16.mxu1 %v2457_v28  ;;  %v1575_v24 = vld [vmem:[%s3320_s10 + $0x38] sm:$0xff]  ;;  %v1574_v25 = vld [vmem:[%s3320_s10 + $0x30] sm:$0xff]  ;;  %v1195_v29 = vld [vmem:[%s3318_s8 + $0x68] sm:$0xff] }
  0x4d   : > { %2428 = vmatpush3.bf16.msra.mxu0 %v2425_v26  ;;  %2460 = vmatpush3.bf16.msra.mxu1 %v2457_v28  ;;  %v679_v26 = vld [vmem:[%s3315_s5 + $0x60] sm:$0xff]  ;;  %v680_v28 = vld [vmem:[%s3315_s5 + $0x68] sm:$0xff]  ;;  %v681_v32 = vld [vmem:[%s3315_s5 + $0x70] sm:$0xff] }
  0x4e   : > { %2191 = vmatprep.mubr.msk.f32.mxu0 %vm715_vm0, %v711_v34  ;;  %2273 = vmatprep.mubr.msk.f32.mxu1 %vm715_vm0, %v1226_v35  ;;  %v1063_v30 = vld [vmem:[%s3317_s7 + $0x48] sm:$0xff]  ;;  %v1062_v31 = vld [vmem:[%s3317_s7 + $0x40] sm:$0xff]  ;;  %v1196_v33 = vld [vmem:[%s3318_s8 + $0x70] sm:$0xff] }
  0x4f   : > { %2192 = vmatmul.mubr.msk.f32.gmra.mrb[12].mxu0 %vm715_vm0, %v712_v37  ;;  %2430 = vmatprep.subr.bf16.mxu0 %v2429_v36  ;;  %v682_v34 = vld [vmem:[%s3315_s5 + $0x78] sm:$0xff]  ;;  %v1576_v37 = vld [vmem:[%s3320_s10 + $0x40] sm:$0xff]  ;;  %v1578_v41 = vld [vmem:[%s3320_s10 + $0x50] sm:$0xff] }
  0x50   : > { %2274 = vmatmul.mubr.msk.f32.gmra.mrb[12].mxu1 %vm715_vm0, %v1227_v38  ;;  %2462 = vmatprep.subr.bf16.mxu1 %v2461_v39  ;;  %v1197_v35 = vld [vmem:[%s3318_s8 + $0x78] sm:$0xff]  ;;  %v1067_v42 = vld [vmem:[%s3317_s7 + $0x68] sm:$0xff]  ;;  %v1580_v45 = vld [vmem:[%s3320_s10 + $0x60] sm:$0xff] }
  0x51   : > { %1586 = vperm.xlu1 %2595, %v1568_v40   ;;  %1072 = vperm.xlu0 %2594, %v1054_v43   ;;  %v1065_v38 = vld [vmem:[%s3317_s7 + $0x58] sm:$0xff]  ;;  %v1066_v43 = vld [vmem:[%s3317_s7 + $0x60] sm:$0xff]  ;;  %v1581_v44 = vld [vmem:[%s3320_s10 + $0x68] sm:$0xff] }
  0x52   : > { %2432 = vmatpush3.bf16.msra.mxu0 %v2429_v36  ;;  %2464 = vmatpush3.bf16.msra.mxu1 %v2461_v39  ;;  %v1577_v36 = vld [vmem:[%s3320_s10 + $0x48] sm:$0xff]  ;;  %v1064_v39 = vld [vmem:[%s3317_s7 + $0x50] sm:$0xff]  ;;  %v1579_v40 = vld [vmem:[%s3320_s10 + $0x58] sm:$0xff] }
  0x53   : > { %2194 = vmatprep.mubr.msk.f32.mxu0 %vm715_vm0, %v713_v46  ;;  %2276 = vmatprep.mubr.msk.f32.mxu1 %vm715_vm0, %v1228_v47  ;;  %v1069_v46 = vld [vmem:[%s3317_s7 + $0x78] sm:$0xff]  ;;  %v1068_v47 = vld [vmem:[%s3317_s7 + $0x70] sm:$0xff] }
  0x54   : > { %2195 = vmatmul.mubr.msk.f32.gmra.mrb[14].mxu0 %vm715_vm0, %v714_v49  ;;  %2434 = vmatprep.subr.bf16.mxu0 %v2433_v48  ;;  %v1582_v49 = vld [vmem:[%s3320_s10 + $0x70] sm:$0xff] }
  0x55   : > { %2277 = vmatmul.mubr.msk.f32.gmra.mrb[14].mxu1 %vm715_vm0, %v1229_v51  ;;  %2466 = vmatprep.subr.bf16.mxu1 %v2465_v50  ;;  %v2707_v51 = vmov 0.0  }
  0x56   : > { %1591 = vperm.xlu1 %2595, %v1569_v52   ;;  %1077 = vperm.xlu0 %2594, %v1055_v53  }
  0x57   : > { %2436 = vmatpush3.bf16.msra.mxu0 %v2433_v48  ;;  %2468 = vmatpush3.bf16.msra.mxu1 %v2465_v50  ;;  %v1583_v48 = vld [vmem:[%s3320_s10 + $0x78] sm:$0xff]  ;;  %v2705_v50 = vmov 0.0|0.0  }
  0x58   : > { %2229 = vmatprep.mubr.f32.mxu0 %v667_v54  ;;  %2311 = vmatprep.mubr.f32.mxu1 %v1182_v55 }
  0x59   : > { %2469 = vmatprep.subr.bf16.mxu1 %v2705_v50  ;;  %2493 = vmatprep.subr.bf16.mxu0 %v2705_v50 }
  0x5a   : > { %2230 = vmatmul.mubr.f32.vlgmr.msra.gmra.mrb[0].mxu0 %v668_v56  ;;  %2312 = vmatmul.mubr.f32.vlgmr.msra.gmra.mrb[0].mxu1 %v1183_v57 }
  0x5b   : > { %1087 = vperm.xlu1 %2595, %v1057_v58   ;;  %1082 = vperm.xlu0 %2594, %v1056_v59  }
  0x5c   : > { %2232 = vmatprep.mubr.f32.mxu0 %v669_v60  ;;  %2314 = vmatprep.mubr.f32.mxu1 %v1184_v61 }
  0x5e   : > { %2233 = vmatmul.mubr.f32.gmra.mrb[2].mxu0 %v670_v62  ;;  %2315 = vmatmul.mubr.f32.gmra.mrb[2].mxu1 %v1185_v63 }
  0x5f   : > { %1601 = vperm.xlu1 %2595, %v1571_v0   ;;  %1596 = vperm.xlu0 %2594, %v1570_v1  }
  0x60   : > { %2235 = vmatprep.mubr.f32.mxu0 %v671_v2  ;;  %2317 = vmatprep.mubr.f32.mxu1 %v1186_v3 }
  0x62   : > { %2236 = vmatmul.mubr.f32.gmra.mrb[4].mxu0 %v672_v4  ;;  %2318 = vmatmul.mubr.f32.gmra.mrb[4].mxu1 %v1187_v5 }
  0x63   : > { %1097 = vperm.xlu1 %2595, %v1059_v6   ;;  %1092 = vperm.xlu0 %2594, %v1058_v7  }
  0x64   : > { %2238 = vmatprep.mubr.f32.mxu0 %v673_v8  ;;  %2320 = vmatprep.mubr.f32.mxu1 %v1188_v9 }
  0x66   : > { %2239 = vmatmul.mubr.f32.gmra.mrb[6].mxu0 %v674_v10  ;;  %2321 = vmatmul.mubr.f32.gmra.mrb[6].mxu1 %v1189_v11 }
  0x67   : > { %1611 = vperm.xlu1 %2595, %v1573_v12   ;;  %1606 = vperm.xlu0 %2594, %v1572_v13  }
  0x68   : > { %2241 = vmatprep.mubr.f32.mxu0 %v675_v14  ;;  %2323 = vmatprep.mubr.f32.mxu1 %v1190_v15 }
  0x6a   : > { %2242 = vmatmul.mubr.f32.gmra.mrb[8].mxu0 %v676_v16  ;;  %2324 = vmatmul.mubr.f32.gmra.mrb[8].mxu1 %v1191_v17 }
  0x6b   : > { %1107 = vperm.xlu1 %2595, %v1061_v18   ;;  %1102 = vperm.xlu0 %2594, %v1060_v19  }
  0x6c   : > { %2244 = vmatprep.mubr.f32.mxu0 %v677_v20  ;;  %2326 = vmatprep.mubr.f32.mxu1 %v1192_v21 }
  0x6e   : > { %2245 = vmatmul.mubr.f32.gmra.mrb[10].mxu0 %v678_v22  ;;  %2327 = vmatmul.mubr.f32.gmra.mrb[10].mxu1 %v1193_v23 }
  0x6f   : > { %1621 = vperm.xlu1 %2595, %v1575_v24   ;;  %1616 = vperm.xlu0 %2594, %v1574_v25  }
  0x70   : > { %2247 = vmatprep.mubr.f32.mxu0 %v679_v26  ;;  %2329 = vmatprep.mubr.f32.mxu1 %v1194_v27 }
  0x72   : > { %2248 = vmatmul.mubr.f32.gmra.mrb[12].mxu0 %v680_v28  ;;  %2330 = vmatmul.mubr.f32.gmra.mrb[12].mxu1 %v1195_v29 }
  0x73   : > { %1117 = vperm.xlu1 %2595, %v1063_v30   ;;  %1112 = vperm.xlu0 %2594, %v1062_v31  }
  0x74   : > { %2250 = vmatprep.mubr.f32.mxu0 %v681_v32  ;;  %2332 = vmatprep.mubr.f32.mxu1 %v1196_v33 }
  0x76   : > { %2251 = vmatmul.mubr.f32.gmra.mrb[14].mxu0 %v682_v34  ;;  %2333 = vmatmul.mubr.f32.gmra.mrb[14].mxu1 %v1197_v35 }
  0x77   : > { %1631 = vperm.xlu1 %2595, %v1577_v36   ;;  %1626 = vperm.xlu0 %2594, %v1576_v37  }
  0x78   : > { %2367 = vmatprep.mubr.msk.f32.mxu1 %vm2706_vm1, %v2707_v51  ;;  %2402 = vmatprep.mubr.msk.f32.mxu0 %vm2706_vm1, %v2707_v51 }
  0x7b   : > { %1127 = vperm.xlu1 %2595, %v1065_v38   ;;  %1122 = vperm.xlu0 %2594, %v1064_v39  }
  0x7f   : > { %1641 = vperm.xlu1 %2595, %v1579_v40   ;;  %1636 = vperm.xlu0 %2594, %v1578_v41  }
  0x83   : > { %1137 = vperm.xlu1 %2595, %v1067_v42   ;;  %1132 = vperm.xlu0 %2594, %v1066_v43  }
  0x87   : > { %1651 = vperm.xlu1 %2595, %v1581_v44   ;;  %1646 = vperm.xlu0 %2594, %v1580_v45  }
  0x8b   : > { %1147 = vperm.xlu1 %2595, %v1069_v46   ;;  %1142 = vperm.xlu0 %2594, %v1068_v47  }
  0x8f   : > { %1661 = vperm.xlu1 %2595, %v1583_v48   ;;  %1656 = vperm.xlu0 %2594, %v1582_v49  }
  0xd0   : > { %v1587_v52 = vpop.permute.xlu1 %1586  ;;  %v1073_v53 = vpop.permute.xlu0 %1072 }
  0xd5   : > { %v1592_v54 = vpop.permute.xlu1 %1591  ;;  %v1078_v55 = vpop.permute.xlu0 %1077 }
  0xda   : > { %v1088_v56 = vpop.permute.xlu1 %1087  ;;  %v1083_v57 = vpop.permute.xlu0 %1082 }
  0xde   : > { %v1602_v58 = vpop.permute.xlu1 %1601  ;;  %v1597_v59 = vpop.permute.xlu0 %1596 }
  0xe2   : > { %v1098_v60 = vpop.permute.xlu1 %1097  ;;  %v1093_v61 = vpop.permute.xlu0 %1092 }
  0xe6   : > { %v1612_v62 = vpop.permute.xlu1 %1611  ;;  %v1607_v63 = vpop.permute.xlu0 %1606 }
  0xea   : > { %v1108_v0 = vpop.permute.xlu1 %1107  ;;  %v1103_v1 = vpop.permute.xlu0 %1102 }
  0xee   : > { %v1622_v2 = vpop.permute.xlu1 %1621  ;;  %v1617_v3 = vpop.permute.xlu0 %1616 }
  0xf2   : > { %v3231_v4 = vpop.permute.xlu1 %1117  ;;  %v3233_v5 = vpop.permute.xlu0 %1112 }
  0xf6   : > { %v3235_v6 = vpop.permute.xlu1 %1631  ;;  %v3237_v7 = vpop.permute.xlu0 %1626 }
  0xfa   : > { %v3239_v8 = vpop.permute.xlu1 %1127  ;;  %v3241_v9 = vpop.permute.xlu0 %1122 }
  0xfe   : > { %v3243_v10 = vpop.permute.xlu1 %1641  ;;  %v3245_v11 = vpop.permute.xlu0 %1636 }
 0x102   : > { %v3247_v20 = vpop.permute.xlu1 %1137  ;;  %v3249_v21 = vpop.permute.xlu0 %1132 }
 0x106   : > { %v3251_v38 = vpop.permute.xlu1 %1651  ;;  %v3253_v39 = vpop.permute.xlu0 %1646 }
 0x12d   : > { %v2231_v12 = vpop.f32.mrb[0].mxu0  ;;  %v2313_v13 = vpop.f32.mrb[0].mxu1 }
 0x12e   : > { %v1151_v14 = vadd.f32 %v2231_v12, %v1078_v55  ;;  %v1665_v15 = vadd.f32 %v2313_v13, %v1592_v54  ;;  %v975_v16 = vpop.f32.mrb[1].mxu0  ;;  %v1489_v17 = vpop.f32.mrb[1].mxu1 }
 0x12f   : > { %v1150_v18 = vadd.f32 %v1073_v53, %v975_v16  ;;  %v1664_v19 = vadd.f32 %v1587_v52, %v1489_v17 }
 0x130   : > { %2596 = vtanh.f32 %v1151_v14 }
 0x131   : > { %2598 = vtanh.f32 %v1665_v15  ;;  %v2234_v22 = vpop.f32.mrb[2].mxu0  ;;  %v2316_v23 = vpop.f32.mrb[2].mxu1 }
 0x132   : > { %2600 = vtanh.f32 %v1150_v18  ;;  %v1153_v24 = vadd.f32 %v2234_v22, %v1088_v56  ;;  %v1667_v25 = vadd.f32 %v2316_v23, %v1602_v58  ;;  %v985_v26 = vpop.f32.mrb[3].mxu0  ;;  %v1499_v27 = vpop.f32.mrb[3].mxu1 }
 0x133   : > { %2602 = vtanh.f32 %v1664_v19  ;;  %v1152_v28 = vadd.f32 %v1083_v57, %v985_v26  ;;  %v1666_v29 = vadd.f32 %v1597_v59, %v1499_v27 }
 0x134   : > { %2604 = vtanh.f32 %v1153_v24 }
 0x135   : > { %2606 = vtanh.f32 %v1667_v25  ;;  %v2237_v30 = vpop.f32.mrb[4].mxu0  ;;  %v2319_v31 = vpop.f32.mrb[4].mxu1 }
 0x136   : > { %2608 = vtanh.f32 %v1152_v28  ;;  %v1155_v32 = vadd.f32 %v2237_v30, %v1098_v60  ;;  %v1669_v33 = vadd.f32 %v2319_v31, %v1612_v62  ;;  %v995_v34 = vpop.f32.mrb[5].mxu0  ;;  %v1509_v35 = vpop.f32.mrb[5].mxu1 }
 0x137   : > { %2610 = vtanh.f32 %v1666_v29  ;;  %v1154_v36 = vadd.f32 %v1093_v61, %v995_v34  ;;  %v1668_v37 = vadd.f32 %v1607_v63, %v1509_v35 }
 0x138   : > { %2612 = vtanh.f32 %v1155_v32 }
 0x139   : > { %2614 = vtanh.f32 %v1669_v33  ;;  %v2240_v40 = vpop.f32.mrb[6].mxu0  ;;  %v2322_v41 = vpop.f32.mrb[6].mxu1 }
 0x13a   : > { %v2597_v42 = vpop.eup %2596  ;;  %2616 = vtanh.f32 %v1154_v36  ;;  %v1157_v43 = vadd.f32 %v2240_v40, %v1108_v0  ;;  %v1671_v44 = vadd.f32 %v2322_v41, %v1622_v2  ;;  %v1005_v45 = vpop.f32.mrb[7].mxu0 }
 0x13b   : > { %v1519_v46 = vpop.f32.mrb[7].mxu1  ;;  %v2599_v47 = vpop.eup %2598  ;;  %2618 = vtanh.f32 %v1668_v37  ;;  %v1156_v48 = vadd.f32 %v1103_v1, %v1005_v45 }
 0x13c   : > { %v1670_v49 = vadd.f32 %v1617_v3, %v1519_v46  ;;  %v2601_v51 = vpop.eup %2600  ;;  %2620 = vtanh.f32 %v1157_v43  ;;  %v1148_v2 = vpop.permute.xlu1 %1147 }
 0x13d   : > { %v2603_v52 = vpop.eup %2602  ;;  %2622 = vtanh.f32 %v1671_v44  ;;  %v2243_v53 = vpop.f32.mrb[8].mxu0  ;;  %v2494_v55 = vpack.c.bf16 %v2597_v42, %v2601_v51 }
 0x13e   : > { %v2325_v54 = vpop.f32.mrb[8].mxu1  ;;  %v2605_v56 = vpop.eup %2604  ;;  %2624 = vtanh.f32 %v1156_v48  ;;  %v1159_v57 = vadd.f32 %v2243_v53, %v3231_v4  ;;  %v2470_v61 = vpack.c.bf16 %v2599_v47, %v2603_v52 }
 0x13f   : > { %v1673_v58 = vadd.f32 %v2325_v54, %v3235_v6  ;;  %v1015_v59 = vpop.f32.mrb[9].mxu0  ;;  %v1529_v60 = vpop.f32.mrb[9].mxu1  ;;  %2626 = vtanh.f32 %v1670_v49  ;;  %2495 = vmatpush3.bf16.msra.mxu0 %v2494_v55 }
 0x140   : > { %v2607_v62 = vpop.eup %2606  ;;  %v1158_v63 = vadd.f32 %v3233_v5, %v1015_v59  ;;  %v1672_v0 = vadd.f32 %v3237_v7, %v1529_v60  ;;  %v3259_v3 = vpop.permute.xlu0 %1142  ;;  %2628 = vtanh.f32 %v1159_v57  ;;  %2471 = vmatpush3.bf16.msra.mxu1 %v2470_v61  ;;  %2496 = vmatprep.subr.bf16.mxu0 %v2705_v50 }
 0x141   : > { %v2609_v1 = vpop.eup %2608  ;;  %2630 = vtanh.f32 %v1673_v58  ;;  %v2246_v6 = vpop.f32.mrb[10].mxu0  ;;  %2472 = vmatprep.subr.bf16.mxu1 %v2705_v50 }
 0x142   : > { %v2611_v4 = vpop.eup %2610  ;;  %v2328_v12 = vpop.f32.mrb[10].mxu1  ;;  %v2497_v13 = vpack.c.bf16 %v2605_v56, %v2609_v1  ;;  %2632 = vtanh.f32 %v1158_v63  ;;  %v1161_v5 = vadd.f32 %v2246_v6, %v3239_v8 }
 0x143   : > { %v2613_v14 = vpop.eup %2612  ;;  %v1675_v7 = vadd.f32 %v2328_v12, %v3243_v10  ;;  %v1025_v15 = vpop.f32.mrb[11].mxu0  ;;  %v2473_v17 = vpack.c.bf16 %v2607_v62, %v2611_v4  ;;  %2634 = vtanh.f32 %v1672_v0  ;;  %v1696_v12 = vld [vmem:[%s3310_s0] sm:$0xff] }
 0x144   : > { %v1539_v16 = vpop.f32.mrb[11].mxu1  ;;  %v2615_v18 = vpop.eup %2614  ;;  %v1160_v19 = vadd.f32 %v3241_v9, %v1025_v15  ;;  %2498 = vmatpush3.bf16.msra.mxu0 %v2497_v13  ;;  %2636 = vtanh.f32 %v1161_v5  ;;  %v1697_v13 = vld [vmem:[%s3311_s1] sm:$0xff] }
 0x145   : > { %v1674_v22 = vadd.f32 %v3245_v11, %v1539_v16  ;;  %v2617_v23 = vpop.eup %2616  ;;  %2474 = vmatpush3.bf16.msra.mxu1 %v2473_v17  ;;  %2499 = vmatprep.subr.bf16.mxu0 %v2705_v50  ;;  %2638 = vtanh.f32 %v1675_v7  ;;  %v2249_v8 = vpop.f32.mrb[12].mxu0 }
 0x146   : > { %v2619_v24 = vpop.eup %2618  ;;  %v2331_v25 = vpop.f32.mrb[12].mxu1  ;;  %2475 = vmatprep.subr.bf16.mxu1 %v2705_v50  ;;  %v2500_v10 = vpack.c.bf16 %v2613_v14, %v2617_v23  ;;  %2640 = vtanh.f32 %v1160_v19  ;;  %v1163_v27 = vadd.f32 %v2249_v8, %v3247_v20 }
 0x147   : > { %v2621_v26 = vpop.eup %2620  ;;  %v1677_v9 = vadd.f32 %v2331_v25, %v3251_v38  ;;  %v1035_v11 = vpop.f32.mrb[13].mxu0  ;;  %v2476_v29 = vpack.c.bf16 %v2615_v18, %v2619_v24  ;;  %2642 = vtanh.f32 %v1674_v22 }
 0x148   : > { %v1549_v28 = vpop.f32.mrb[13].mxu1  ;;  %v2623_v30 = vpop.eup %2622  ;;  %v1162_v31 = vadd.f32 %v3249_v21, %v1035_v11  ;;  %2501 = vmatpush3.bf16.msra.mxu0 %v2500_v10  ;;  %2644 = vtanh.f32 %v1163_v27 }
 0x149   : > { %v1676_v32 = vadd.f32 %v3253_v39, %v1549_v28  ;;  %v2625_v33 = vpop.eup %2624  ;;  %v1662_v34 = vpop.permute.xlu1 %1661  ;;  %2477 = vmatpush3.bf16.msra.mxu1 %v2476_v29  ;;  %2502 = vmatprep.subr.bf16.mxu0 %v2705_v50  ;;  %2646 = vtanh.f32 %v1677_v9 }
 0x14a   : > { %v1657_v35 = vpop.permute.xlu0 %1656  ;;  %v2627_v20 = vpop.eup %2626  ;;  %2478 = vmatprep.subr.bf16.mxu1 %v2705_v50  ;;  %v2503_v38 = vpack.c.bf16 %v2621_v26, %v2625_v33  ;;  %2648 = vtanh.f32 %v1162_v31 }
 0x14b   : > { %v2252_v36 = vpop.f32.mrb[14].mxu0  ;;  %v2334_v37 = vpop.f32.mrb[14].mxu1  ;;  %v2479_v43 = vpack.c.bf16 %v2623_v30, %v2627_v20  ;;  %2650 = vtanh.f32 %v1676_v32 }
 0x14c   : > { %v2629_v40 = vpop.eup %2628  ;;  %v1165_v21 = vadd.f32 %v2252_v36, %v1148_v2  ;;  %v1679_v41 = vadd.f32 %v2334_v37, %v1662_v34  ;;  %v1045_v39 = vpop.f32.mrb[15].mxu0  ;;  %2504 = vmatpush3.bf16.msra.mxu0 %v2503_v38 }
 0x14d   : > { %v1559_v42 = vpop.f32.mrb[15].mxu1  ;;  %v2631_v44 = vpop.eup %2630  ;;  %v1164_v45 = vadd.f32 %v3259_v3, %v1045_v39  ;;  %2480 = vmatpush3.bf16.msra.mxu1 %v2479_v43  ;;  %2505 = vmatprep.subr.bf16.mxu0 %v2705_v50 }
 0x14e   : > { %v1678_v46 = vadd.f32 %v1657_v35, %v1559_v42  ;;  %v2633_v47 = vpop.eup %2632  ;;  %2652 = vtanh.f32 %v1165_v21  ;;  %2481 = vmatprep.subr.bf16.mxu1 %v2705_v50 }
 0x14f   : > { %v2635_v48 = vpop.eup %2634  ;;  %2654 = vtanh.f32 %v1679_v41  ;;  %v2506_v49 = vpack.c.bf16 %v2629_v40, %v2633_v47 }
 0x150   : > { %v2637_v51 = vpop.eup %2636  ;;  %2656 = vtanh.f32 %v1164_v45  ;;  %v2482_v52 = vpack.c.bf16 %v2631_v44, %v2635_v48 }
 0x151   : > { %v2639_v53 = vpop.eup %2638  ;;  %2658 = vtanh.f32 %v1678_v46  ;;  %2507 = vmatpush3.bf16.msra.mxu0 %v2506_v49 }
 0x152   : > { %v2641_v54 = vpop.eup %2640  ;;  %2483 = vmatpush3.bf16.msra.mxu1 %v2482_v52  ;;  %2508 = vmatprep.subr.bf16.mxu0 %v2705_v50 }
 0x153   : > { %v2643_v55 = vpop.eup %2642  ;;  %2484 = vmatprep.subr.bf16.mxu1 %v2705_v50  ;;  %v2509_v56 = vpack.c.bf16 %v2637_v51, %v2641_v54 }
 0x154   : > { %v2645_v57 = vpop.eup %2644  ;;  %v2485_v58 = vpack.c.bf16 %v2639_v53, %v2643_v55 }
 0x155   : > { %v2647_v59 = vpop.eup %2646  ;;  %2510 = vmatpush3.bf16.msra.mxu0 %v2509_v56 }
 0x156   : > { %v2649_v60 = vpop.eup %2648  ;;  %2486 = vmatpush3.bf16.msra.mxu1 %v2485_v58  ;;  %2511 = vmatprep.subr.bf16.mxu0 %v2705_v50 }
 0x157   : > { %v2651_v61 = vpop.eup %2650  ;;  %2487 = vmatprep.subr.bf16.mxu1 %v2705_v50  ;;  %v2512_v62 = vpack.c.bf16 %v2645_v57, %v2649_v60 }
 0x158   : > { %v2653_v63 = vpop.eup %2652  ;;  %v2488_v0 = vpack.c.bf16 %v2647_v59, %v2651_v61 }
 0x159   : > { %v2655_v1 = vpop.eup %2654  ;;  %2513 = vmatpush3.bf16.msra.mxu0 %v2512_v62 }
 0x15a   : > { %v2657_v2 = vpop.eup %2656  ;;  %2489 = vmatpush3.bf16.msra.mxu1 %v2488_v0  ;;  %2514 = vmatprep.subr.bf16.mxu0 %v2705_v50 }
 0x15b   : > { %v2659_v3 = vpop.eup %2658  ;;  %2490 = vmatprep.subr.bf16.mxu1 %v2705_v50  ;;  %v2515_v4 = vpack.c.bf16 %v2653_v63, %v2657_v2 }
 0x15c   : > { %v2491_v6 = vpack.c.bf16 %v2655_v1, %v2659_v3 }
 0x15d   : > { %2516 = vmatpush3.bf16.msra.mxu0 %v2515_v4 }
 0x15e   : > { %2492 = vmatpush3.bf16.msra.mxu1 %v2491_v6 }
 0x160   : > { %2403 = vmatmul.mubr.f32.vlgmr.msra.gmra.mrb[16].mxu0 %v1696_v12 }
 0x161   : > { %2368 = vmatmul.mubr.f32.vlgmr.msra.gmra.mrb[16].mxu1 %v1697_v13 }
 0x233   : > { %v1834_v14 = vpop.f32.mrb[16].mxu0 }
 0x234   : > { %v1764_v5 = vpop.f32.mrb[16].mxu1  ;;  %v2404_v7 = vpop.f32.mrb[17].mxu0 }
 0x235   : > { %v1835_v15 = vadd.f32 %v1834_v14, %v1764_v5  ;;  %v2369_v50 = vpop.f32.mrb[17].mxu1 }
 0x237   : > { %v2036_v16 = vmul.f32 -1.442695, %v1835_v15 }
 0x239   : > { %2660 = vpow2.f32 %v2036_v16 }
 0x243   : > { %v2661_v17 = vpop.eup %2660 }
 0x244   : > { %v1841_v18 = vadd.f32 1.0, %v2661_v17 }
 0x246   : > { %2662 = vrcp.f32 %v1841_v18 }
 0x250   : > { %v2663_v19 = vpop.eup %2662 }
 0x251   : > { %1844 = vst [vmem:[%s665_s17] sm:$0xff] %v2663_v19 }
 0x252 PF: > { %s21_s21 = sadd.s32 1, %s2702_s21   ;;  %s3323_s17 = smov %s2690_s18 }
 0x253   : > { %p18_p10 = scmp.ge.s32.totalorder %s21_s21, 4   ;;  %s3324_s18 = smov %s2807_s26 }
 0x254   : > { %s3325_s19 = smov %s2698_s20  ;;  %s3326_s20 = smov %s3328_s22 }
 0x255   :  { %20 = sbr.rel (!%p18_p10) target bundleno = 3 (0x3), region = 192 }

</bundles_post_ra>
